<compile_context>
chip_gen: v7x
topology: tpu7x:2x2x1
jax: 0.10.0
libtpu: 0.0.40
codegen_flags: <defaults>
</compile_context>

<pallas_src>
import jax
import jax.numpy as jnp
from jax.experimental import pallas as pl
from jax.experimental.pallas import tpu as pltpu


# ---------------------------------------------------------------------------
# Kernels
# ---------------------------------------------------------------------------
def _hloss_rows_kernel(x_ref, o_ref):
    """Whole class dim in one tile.  x_ref: (tb, C) logits; o_ref: (tb, 1) per-row entropy."""
    xin = x_ref[...]
    # max is exact in the input dtype (bf16 included); saves an f32 VPU pass.
    m = jnp.max(xin, axis=1, keepdims=True).astype(jnp.float32)
    x = xin.astype(jnp.float32)
    z = x - m
    e = jnp.exp(z)
    s = jnp.sum(e, axis=1, keepdims=True)           # softmax denominator (>= 1)
    ez = jnp.sum(e * z, axis=1, keepdims=True)      # sum_c e*z
    # p = e/s, logp = z - log(s)  =>  -sum_c p*logp = log(s) - ez/s   (exact division)
    o_ref[...] = jnp.log(s) - ez / s


def _hloss_rows_ctiled_kernel(x_ref, o_ref, m_sc, s_sc, ez_sc):
    """Class-tiled path with online (flash-style) rescaling of running m / s / ez.

    x_ref: (tb, tc) logits block; o_ref: (tb, 1); scratch m/s/ez: (tb, 1) f32.
    Invariant after step j:  s = sum exp(x - m),  ez = sum exp(x - m)*(x - m)  over seen blocks.
    """
    j = pl.program_id(1)

    @pl.when(j == 0)
    def _():
        m_sc[...] = jnp.full(m_sc.shape, -jnp.inf, dtype=m_sc.dtype)
        s_sc[...] = jnp.zeros(s_sc.shape, dtype=s_sc.dtype)
        ez_sc[...] = jnp.zeros(ez_sc.shape, dtype=ez_sc.dtype)

    xin = x_ref[...]
    mb = jnp.max(xin, axis=1, keepdims=True).astype(jnp.float32)
    x = xin.astype(jnp.float32)

    m_old = m_sc[...]
    s_old = s_sc[...]
    m_new = jnp.maximum(m_old, mb)
    z = x - m_new
    e = jnp.exp(z)

    delta = m_old - m_new                 # <= 0; -inf only on the first block (s_old == 0)
    a = jnp.exp(delta)                    # rescale factor for old terms (0 on first block)
    # old z shifts by delta, old e scales by a:  ez' = a*(ez + delta*s); guard -inf*0 -> nan
    ez_shift = jnp.where(s_old > 0.0, delta * s_old, 0.0)
    ez_sc[...] = a * (ez_sc[...] + ez_shift) + jnp.sum(e * z, axis=1, keepdims=True)
    s_sc[...] = a * s_old + jnp.sum(e, axis=1, keepdims=True)
    m_sc[...] = m_new

    @pl.when(j == pl.num_programs(1) - 1)
    def _():
        s = s_sc[...]
        o_ref[...] = jnp.log(s) - ez_sc[...] / s


# ---------------------------------------------------------------------------
# Tiling / budget helpers
# ---------------------------------------------------------------------------
_SUBLANE_GRAN = {1: 32, 2: 16, 4: 8}   # packed-sublane granularity per itemsize


def _round_up(n, m):
    return ((n + m - 1) // m) * m


def _vmem_capacity_bytes():
    try:
        return int(pltpu.get_tpu_info().vmem_capacity_bytes)
    except Exception:
        return 64 * 1024 * 1024          # conservative: v7x per-TC physical VMEM


def _budgets():
    """(working_set_budget, vmem_limit_bytes) for input double-buffer + f32 temporaries."""
    cap = _vmem_capacity_bytes()
    work = min(48 * 1024 * 1024, cap // 2)          # 48 MiB on 128 MiB chips, 32 MiB on v7x
    limit = min(cap, work + 16 * 1024 * 1024)       # explicit scoped-VMEM limit with headroom
    return work, limit


# ---------------------------------------------------------------------------
# Wrapper
# ---------------------------------------------------------------------------
def hloss(x: jax.Array, *, _force_row_tile=None, _force_class_tile=None) -> jax.Array:
    """Pallas TPU implementation of HLoss.forward.  x: (B, C) logits."""
    B, C = x.shape
    itemsize = jnp.dtype(x.dtype).itemsize
    gran = _SUBLANE_GRAN.get(itemsize, 8)
    work_budget, vmem_limit = _budgets()
    # Working-set bytes per element: double-buffered input + ~3x f32 temporaries (cast, e, e*z).
    wbytes = 2 * itemsize + 3 * 4

    per_row = C * wbytes
    tb_simple = (work_budget // per_row) // gran * gran
    use_ctiled = (_force_class_tile is not None) or (tb_simple < gran)

    if not use_ctiled:
        # --- simple path: whole class dim per tile, row-tiled streaming ------------------
        tb = min(tb_simple, _round_up(B, gran))
        if _force_row_tile is not None:
            tb = _force_row_tile
        n_tiles = pl.cdiv(B, tb)
        B_pad = n_tiles * tb
        xp = jnp.pad(x, ((0, B_pad - B), (0, 0))) if B_pad != B else x

        rows = pl.pallas_call(
            _hloss_rows_kernel,
            out_shape=jax.ShapeDtypeStruct((B_pad, 1), jnp.float32),
            grid_spec=pltpu.PrefetchScalarGridSpec(
                num_scalar_prefetch=0,
                grid=(n_tiles,),
                in_specs=[pl.BlockSpec((tb, C), lambda i: (i, 0))],
                out_specs=pl.BlockSpec((tb, 1), lambda i: (i, 0)),
            ),
            compiler_params=pltpu.CompilerParams(
                dimension_semantics=("parallel",),
                vmem_limit_bytes=vmem_limit,
            ),
        )(xp)
    else:
        # --- large-C path: tile the class dim, online rescaling in VMEM scratch ----------
        tb = _force_row_tile if _force_row_tile is not None else min(_round_up(B, gran), 512)
        if _force_class_tile is not None:
            tc = _force_class_tile
        else:
            tc = max(128, (work_budget // (tb * wbytes)) // 128 * 128)
        tc = min(tc, _round_up(C, 128))

        n_row = pl.cdiv(B, tb)
        n_col = pl.cdiv(C, tc)
        B_pad, C_pad = n_row * tb, n_col * tc
        # Pad with a large-magnitude negative finite value: exp underflows to exactly 0 and
        # 0 * (finite) == 0, so padded class columns contribute nothing to s / ez.
        if jnp.issubdtype(x.dtype, jnp.floating):
            neg = float(jnp.finfo(x.dtype).min) * 0.5
        else:
            neg = -1e9
        if B_pad != B or C_pad != C:
            xp = jnp.pad(x, ((0, B_pad - B), (0, C_pad - C)), constant_values=neg)
        else:
            xp = x

        rows = pl.pallas_call(
            _hloss_rows_ctiled_kernel,
            out_shape=jax.ShapeDtypeStruct((B_pad, 1), jnp.float32),
            grid_spec=pltpu.PrefetchScalarGridSpec(
                num_scalar_prefetch=0,
                grid=(n_row, n_col),                       # reduction (class) axis last
                in_specs=[pl.BlockSpec((tb, tc), lambda i, j: (i, j))],
                out_specs=pl.BlockSpec((tb, 1), lambda i, j: (i, 0)),
                scratch_shapes=[pltpu.VMEM((tb, 1), jnp.float32)] * 3,   # m, s, ez
            ),
            compiler_params=pltpu.CompilerParams(
                dimension_semantics=("parallel", "arbitrary"),
                vmem_limit_bytes=vmem_limit,
            ),
        )(xp)

    # Tiny final reduction (and padded-row drop) in the wrapper.
    return jnp.sum(rows[:B, 0])


def hloss_ref(x: jax.Array) -> jax.Array:
    """Pure-JAX reference matching torch semantics."""
    x = x.astype(jnp.float32)
    p = jax.nn.softmax(x, axis=1)
    logp = jax.nn.log_softmax(x, axis=1)
    return -1.0 * jnp.sum(p * logp)


if __name__ == "__main__":
    key = jax.random.PRNGKey(0)

    # Primary test: small logits batch, classes along dim=1 (simple path).
    B, C = 16, 32
    x = jax.random.normal(key, (B, C), dtype=jnp.float32) * 3.0
    out = hloss(x)
    jax.block_until_ready(out)
    ref = hloss_ref(x)
    assert jnp.allclose(out, ref, rtol=1e-4, atol=1e-4), (out, ref)

    # Sanity-check the large-C (class-tiled, online-softmax) path at a small forced tiling,
    # including row and class padding (B=20 not multiple of 8, C=300 not multiple of 128).
    x2 = jax.random.normal(jax.random.PRNGKey(0), (20, 300), dtype=jnp.float32) * 2.0
    out2 = hloss(x2, _force_row_tile=8, _force_class_tile=128)
    jax.block_until_ready(out2)
    ref2 = hloss_ref(x2)
    assert jnp.allclose(out2, ref2, rtol=1e-4, atol=1e-4), (out2, ref2)

    print("KERNEL_OK")
</pallas_src>

<mosaic_0001>
module attributes {stable_mosaic.version = 11 : i64} {
  func.func @_hloss_rows_kernel(%arg0: i32, %arg1: memref<16x32xf32, #tpu.memory_space<vmem>>, %arg2: memref<16x1xf32, #tpu.memory_space<vmem>>) attributes {dimension_semantics = [#tpu.dimension_semantics<parallel>], iteration_bounds = array<i64: 1>, scalar_prefetch = 0 : i64, scratch_operands = 0 : i64, tpu.core_type = #tpu.core_type<tc>, window_params = [{transform_indices = @transform_0, window_bounds = array<i64: 16, 32>}, {transform_indices = @transform_1, window_bounds = array<i64: 16, 1>}]} {
    %c0 = arith.constant 0 : index
    %c0_0 = arith.constant 0 : index
    %0 = vector.load %arg1[%c0, %c0_0] : memref<16x32xf32, #tpu.memory_space<vmem>>, vector<16x32xf32>
    %cst = arith.constant dense<0xFF800000> : vector<16xf32>
    %1 = vector.multi_reduction <maximumf>, %0, %cst [1] : vector<16x32xf32> to vector<16xf32>
    %2 = vector.shape_cast %1 : vector<16xf32> to vector<16x1xf32>
    %3 = vector.broadcast %2 : vector<16x1xf32> to vector<16x32xf32>
    %4 = arith.subf %0, %3 : vector<16x32xf32>
    %5 = math.exp %4 : vector<16x32xf32>
    %cst_1 = arith.constant dense<0.000000e+00> : vector<16xf32>
    %6 = vector.multi_reduction <add>, %5, %cst_1 [1] : vector<16x32xf32> to vector<16xf32>
    %7 = vector.shape_cast %6 : vector<16xf32> to vector<16x1xf32>
    %8 = arith.mulf %5, %4 : vector<16x32xf32>
    %cst_2 = arith.constant dense<0.000000e+00> : vector<16xf32>
    %9 = vector.multi_reduction <add>, %8, %cst_2 [1] : vector<16x32xf32> to vector<16xf32>
    %10 = vector.shape_cast %9 : vector<16xf32> to vector<16x1xf32>
    %11 = math.log %7 : vector<16x1xf32>
    %12 = arith.divf %10, %7 : vector<16x1xf32>
    %13 = arith.subf %11, %12 : vector<16x1xf32>
    %c0_3 = arith.constant 0 : index
    %c0_4 = arith.constant 0 : index
    %14 = vector.load %arg2[%c0_3, %c0_4] : memref<16x1xf32, #tpu.memory_space<vmem>>, vector<16x1xf32>
    tpu.vector_store %arg2[%c0_3, %c0_4], %13 {strides = array<i32>} : memref<16x1xf32, #tpu.memory_space<vmem>>, vector<16x1xf32>,
    return
  }
  func.func @transform_0(%arg0: i32) -> (i32, i32) {
    %c0_i32 = arith.constant 0 : i32
    %c0_i32_0 = arith.constant 0 : i32
    return %arg0, %c0_i32 : i32, i32
  }
  func.func @transform_1(%arg0: i32) -> (i32, i32) {
    %c0_i32 = arith.constant 0 : i32
    %c0_i32_0 = arith.constant 0 : i32
    return %arg0, %c0_i32 : i32, i32
  }
}

</mosaic_0001>

<bundles_post_ra>
// kernel: tpu_custom_call.1
= control target key start
LH: loop header
LB: loop body
LE: loop exit
PB: predicated region body
PF: predicated region fallthrough
CT: control target
= control target key end

     0   :  { %6 = vsyncpa [#allocation3], 0  ;;  %s108_s6 = smov [#allocation2]   ;;  %s145_s0 = inlined_call_operand.hbm [shape: f32[16,32], index: 0, kind: input, shape index: {}]   ;;  %s146_s1 = inlined_call_operand.vmem [shape: f32[16,1], index: 1, kind: output, shape index: {}]  }
   0x1   :  { %s12_s7 = sshll.u32 %s108_s6, 4  ;;  %s84_s10 = scalar_lea.hbm %s145_s0, 256  ;;  %s13_s7 = int_to_ptr.vmem [resolvable:$true] %s12_s7 }
   0x2   :  { %p85_p0 = scmp.ne.s32.totalorder %s145_s0, %s84_s10  ;;  %p88_p1 = scmp.lt.u32.totalorder %s84_s10, %s145_s0 }
   0x4   :  { %p90_p2 = pnand %p88_p1, %p85_p0 }
   0x6   :  { %93 = shalt.err (!%p90_p2)
}
   0x7   :  { %s94_s15 = scalar_lea.vmem %s13_s7, 256  ;;  %p99_p4 = scmp.lt.s32.totalorder %s13_s7, %s13_s7 }
   0x8   :  { %p95_p3 = scmp.ne.s32.totalorder %s13_s7, %s94_s15  ;;  %p100_p5 = scmp.lt.s32.totalorder %s94_s15, %s94_s15 }
   0xa   :  { %p101_p6 = por %p100_p5, %p99_p4 }
   0xc   :  { %p102_p7 = pnand %p101_p6, %p95_p3 }
   0xe   :  { %105 = shalt.err (!%p102_p7)
}
   0xf   :  { %s109_s16 = smov 128   ;;  %s110_s17 = smov 8  }
  0x10   :  { %18 = dma.hbm_to_vmem [thread:$0]  %s145_s0, 256, %s13_s7, [#allocation3], %s109_s16, %s109_s16, %s110_s17  }
  0x11   :  { %106 = dma.done.wait [#allocation3], 256  }
  0x12   :  { %107 = vsyncadd [#allocation3], 4294967040  ;;  %vm24_vm0 = vcmask 261120   ;;  %v22_v0 = vld [vmem:[#allocation2] sm:$0xff]  ;;  %v23_v1 = vld [vmem:[#allocation2 + $0x8] sm:$0xff]  ;;  %vm61_vm1 = vcmask 7168  }
  0x13   :  { %v25_v2 = vsel %vm24_vm0, %v22_v0, -inf  ;;  %v28_v3 = vsel %vm24_vm0, %v23_v1, -inf }
  0x14   :  { %26 = vmax.xlane.f32.xlu0 %v25_v2 }
  0x18   :  { %29 = vmax.xlane.f32.xlu0 %v28_v3 }
  0xa1   :  { %v27_v4 = vpop.xlane.xlu0 %26 }
  0xa2   :  { %v31_v5 = vsub.f32 %v22_v0, %v27_v4 }
  0xa4   :  { %v33_v6 = vmul.f32 1.442695, %v31_v5 }
  0xa5   :  { %v30_v7 = vpop.xlane.xlu0 %29 }
  0xa6   :  { %72 = vpow2.f32 %v33_v6  ;;  %v32_v8 = vsub.f32 %v23_v1, %v30_v7 }
  0xa8   :  { %v35_v9 = vmul.f32 1.442695, %v32_v8 }
  0xaa   :  { %74 = vpow2.f32 %v35_v9 }
  0xb0   :  { %v73_v10 = vpop.eup %72 }
  0xb1   :  { %v37_v11 = vsel %vm24_vm0, %v73_v10, 0.0  ;;  %v43_v12 = vmul.f32 %v73_v10, %v31_v5 }
  0xb2   :  { %38 = vadd.xlane.f32.xlu1 %v37_v11 }
  0xb3   :  { %v45_v13 = vsel %vm24_vm0, %v43_v12, 0.0 }
  0xb4   :  { %v75_v14 = vpop.eup %74  ;;  %46 = vadd.xlane.f32.xlu0 %v45_v13 }
  0xb5   :  { %v40_v15 = vsel %vm24_vm0, %v75_v14, 0.0  ;;  %v44_v16 = vmul.f32 %v75_v14, %v32_v8 }
  0xb6   :  { %41 = vadd.xlane.f32.xlu1 %v40_v15 }
  0xb7   :  { %v48_v17 = vsel %vm24_vm0, %v44_v16, 0.0 }
  0xba   :  { %49 = vadd.xlane.f32.xlu1 %v48_v17 }
 0x13f   :  { %v39_v18 = vpop.xlane.xlu1 %38 }
 0x140   :  { %76 = vlog2.f32 %v39_v18 }
 0x141   :  { %78 = vrcp.f32 %v39_v18  ;;  %v47_v23 = vpop.xlane.xlu0 %46 }
 0x143   :  { %v42_v19 = vpop.xlane.xlu1 %41 }
 0x144   :  { %80 = vlog2.f32 %v42_v19 }
 0x145   :  { %82 = vrcp.f32 %v42_v19 }
 0x147   :  { %v50_v29 = vpop.xlane.xlu1 %49 }
 0x14a   :  { %v77_v20 = vpop.eup %76 }
 0x14b   :  { %v79_v21 = vpop.eup %78  ;;  %v52_v22 = vmul.f32 0.6931472, %v77_v20 }
 0x14c   :  { %v56_v24 = vmul.f32 %v79_v21, %v47_v23 }
 0x14e   :  { %v81_v25 = vpop.eup %80  ;;  %v59_v26 = vsub.f32 %v52_v22, %v56_v24 }
 0x14f   :  { %v83_v27 = vpop.eup %82  ;;  %v54_v28 = vmul.f32 0.6931472, %v81_v25 }
 0x150   :  { %62 = vst.msk [vmem:[%s146_s1] sm:$0xff] %vm61_vm1, %v59_v26  ;;  %v58_v30 = vmul.f32 %v83_v27, %v50_v29 }
 0x152   :  { %v60_v31 = vsub.f32 %v54_v28, %v58_v30 }
 0x154   :  { %63 = vst.msk [vmem:[%s146_s1 + $0x8] sm:$0xff] %vm61_vm1, %v60_v31 }
 0x155   :  { %68 = vsyncpa [#allocation3], 1 }

</bundles_post_ra>
